<compile_context>
chip_gen: v6e
topology: v6e:2x2x1
jax: 0.10.0
libtpu: 0.0.40
codegen_flags: <defaults>
</compile_context>

<pallas_src>
import functools

import jax
import jax.numpy as jnp
from jax.experimental import pallas as pl
from jax.experimental.pallas import tpu as pltpu


def _round_up(x, m):
    return ((x + m - 1) // m) * m


def patch_embed_kernel(x_ref, w_ref, b_ref, o_ref):
    # x_ref: (TM, K)     tile of flattened patches (compute dtype, e.g. bf16)
    # w_ref: (K,  E_pad) projection weight, resident across the whole grid
    # b_ref: (1,  E_pad) bias (f32)
    # o_ref: (TM, E_pad) output tile (lane-dense: E_pad % 128 == 0 -> unmasked vst)
    acc = jnp.dot(x_ref[...], w_ref[...], preferred_element_type=jnp.float32)
    o_ref[...] = (acc + b_ref[...]).astype(o_ref.dtype)


def patch_embed_init(w, b, *, compute_dtype=jnp.bfloat16):
    """One-time parameter prep (kept OFF the per-call hot path).

    w: [E, C, p, p] Conv2d weight (PyTorch OIHW layout); b: [E] bias.
    Returns (w2d [K, E_pad] in compute_dtype, b2d [1, E_pad] float32).
    """
    E = w.shape[0]
    K = w.shape[1] * w.shape[2] * w.shape[3]
    E_pad = _round_up(E, 128)
    w2d = w.reshape(E, K).T.astype(compute_dtype)          # (K, E), (C,kh,kw) flatten
    b2d = b.reshape(1, E).astype(jnp.float32)
    if E_pad != E:
        w2d = jnp.pad(w2d, ((0, 0), (0, E_pad - E)))
        b2d = jnp.pad(b2d, ((0, 0), (0, E_pad - E)))
    return w2d, b2d


def _choose_tile_m(M, tile_m):
    """Largest multiple-of-8 tile <= min(tile_m, M); prefer an even grid (v7x 2 TCs)."""
    if M <= 8:
        return M, 1
    tm = max(8, (min(tile_m, M) // 8) * 8)
    gm = pl.cdiv(M, tm)
    if gm > 1 and gm % 2 == 1:
        tm_alt = max(8, _round_up(pl.cdiv(M, gm + 1), 8))
        gm_alt = pl.cdiv(M, tm_alt)
        if gm_alt % 2 == 0:
            tm, gm = tm_alt, gm_alt
    return tm, gm


@functools.partial(
    jax.jit,
    static_argnames=("patch_size", "embed_dim", "tile_m", "compute_dtype"))
def _patch_embed_tokens(x, w2d, b2d, *, patch_size, embed_dim,
                        tile_m=1024, compute_dtype=jnp.bfloat16):
    B, C, H, W = x.shape
    p = patch_size
    assert H % p == 0 and W % p == 0, "image size must be divisible by patch size"
    gh, gw = H // p, W // p
    num_patches = gh * gw
    M = B * num_patches
    K = C * p * p
    E = embed_dim
    E_pad = w2d.shape[1]
    assert w2d.shape[0] == K and E_pad % 128 == 0

    # Cast first so the relayout below moves half-width data, then patchify:
    # [B,C,H,W] -> [B,C,gh,p,gw,p] -> [B,gh,gw,C,p,p] -> [M,K]; the (C,p,p) flatten
    # order matches the conv weight's (C,kh,kw) flattening in patch_embed_init.
    # TODO(synk): fuse this NCHW -> patch-row relayout into the kernel (in-VMEM XLU
    # transpose of a (C,p,gw,p) strip per gh row) to drop the extra HBM read+write of
    # x; kept at the XLA level here because the minor-dim-splitting relayout does not
    # lower robustly in Mosaic for small patch sizes.
    xc = x.astype(compute_dtype)
    patches = xc.reshape(B, C, gh, p, gw, p).transpose(0, 2, 4, 1, 3, 5).reshape(M, K)

    tm, grid_m = _choose_tile_m(M, tile_m)

    # VMEM actually resident: double-buffered input/output tiles + the (default
    # double-buffered, but DMA'd only once) resident weight and bias, plus headroom.
    csize = jnp.dtype(compute_dtype).itemsize
    osize = jnp.dtype(x.dtype).itemsize
    vmem_bytes = (2 * tm * K * csize          # patch-row tiles (pipelined)
                  + 2 * tm * E_pad * osize    # output tiles (pipelined)
                  + 2 * K * E_pad * csize     # resident weight
                  + 2 * E_pad * 4)            # resident bias
    vmem_limit = int(min(max(vmem_bytes + (4 << 20), 16 << 20), 48 << 20))

    out2d = pl.pallas_call(
        patch_embed_kernel,
        out_shape=jax.ShapeDtypeStruct((M, E_pad), x.dtype),
        grid_spec=pltpu.PrefetchScalarGridSpec(
            num_scalar_prefetch=0,
            grid=(grid_m,),
            in_specs=[
                pl.BlockSpec((tm, K), lambda i: (i, 0)),      # patch-row tile
                pl.BlockSpec((K, E_pad), lambda i: (0, 0)),   # weight (resident)
                pl.BlockSpec((1, E_pad), lambda i: (0, 0)),   # bias (resident)
            ],
            out_specs=pl.BlockSpec((tm, E_pad), lambda i: (i, 0)),
        ),
        compiler_params=pltpu.CompilerParams(
            dimension_semantics=("parallel",),   # M axis shards across v7x's two TCs
            vmem_limit_bytes=vmem_limit,
        ),
    )(patches, w2d, b2d)

    if E_pad != E:                    # no-op when embed_dim % 128 == 0 (e.g. 768)
        out2d = out2d[:, :E]
    return out2d.reshape(B, num_patches, E)


def patch_embed_forward(x, w2d, b2d, *, patch_size, embed_dim,
                        tile_m=1024, compute_dtype=jnp.bfloat16):
    """PatchEmbed forward: returns (tokens [B, num_patches, E], H, W)."""
    tokens = _patch_embed_tokens(x, w2d, b2d, patch_size=patch_size,
                                 embed_dim=embed_dim, tile_m=tile_m,
                                 compute_dtype=compute_dtype)
    return tokens, x.shape[2], x.shape[3]


def patch_embed_reference(x, w, b, *, patch_size):
    """Independent reference via lax conv (matches nn.Conv2d + flatten + transpose)."""
    p = patch_size
    y = jax.lax.conv_general_dilated(
        x, w, window_strides=(p, p), padding="VALID",
        dimension_numbers=("NCHW", "OIHW", "NCHW"))
    y = y + b.reshape(1, -1, 1, 1)
    B, E, gh, gw = y.shape
    return y.reshape(B, E, gh * gw).transpose(0, 2, 1)


if __name__ == "__main__":
    key = jax.random.PRNGKey(0)
    B, C, Himg, Wimg = 2, 4, 16, 16           # small image batch
    patch_size, embed_dim = 4, 32             # -> 16 patches of dim 32

    kx, kw, kb = jax.random.split(key, 3)
    x = jax.random.normal(kx, (B, C, Himg, Wimg), dtype=jnp.float32)
    w = jax.random.normal(kw, (embed_dim, C, patch_size, patch_size),
                          dtype=jnp.float32) * 0.02        # proj.weight (OIHW)
    b = jax.random.normal(kb, (embed_dim,), dtype=jnp.float32) * 0.02   # proj.bias

    y_ref = patch_embed_reference(x, w, b, patch_size=patch_size)
    num_patches = (Himg // patch_size) * (Wimg // patch_size)

    # f32-operand path (tight check of the GEMM + layout plumbing).
    w32, b32 = patch_embed_init(w, b, compute_dtype=jnp.float32)
    y32, H_out, W_out = patch_embed_forward(
        x, w32, b32, patch_size=patch_size, embed_dim=embed_dim,
        compute_dtype=jnp.float32)
    jax.block_until_ready(y32)
    assert y32.shape == (B, num_patches, embed_dim), y32.shape
    assert (H_out, W_out) == (Himg, Wimg)
    assert jnp.allclose(y32, y_ref, atol=2e-4, rtol=2e-4), "f32 path mismatch"

    # bf16-operand path (production default: half the HBM traffic, f32 accumulation).
    wbf, bbf = patch_embed_init(w, b)                       # bf16 weight
    y, _, _ = patch_embed_forward(x, wbf, bbf, patch_size=patch_size,
                                  embed_dim=embed_dim)
    jax.block_until_ready(y)
    assert y.shape == (B, num_patches, embed_dim), y.shape
    assert jnp.allclose(y, y_ref, atol=3e-2, rtol=3e-2), "bf16 path mismatch"

    print("KERNEL_OK")
</pallas_src>

<mosaic_0001>
module attributes {stable_mosaic.version = 11 : i64} {
  func.func @patch_embed_kernel(%arg0: i32, %arg1: memref<32x64xf32, #tpu.memory_space<vmem>>, %arg2: memref<64x128xf32, #tpu.memory_space<vmem>>, %arg3: memref<1x128xf32, #tpu.memory_space<vmem>>, %arg4: memref<32x128xf32, #tpu.memory_space<vmem>>) attributes {dimension_semantics = [#tpu.dimension_semantics<parallel>], iteration_bounds = array<i64: 1>, scalar_prefetch = 0 : i64, scratch_operands = 0 : i64, tpu.core_type = #tpu.core_type<tc>, window_params = [{transform_indices = @transform_0, window_bounds = array<i64: 32, 64>}, {pipeline_mode = #tpu.pipeline_mode<synchronous>, transform_indices = @transform_1, window_bounds = array<i64: 64, 128>}, {pipeline_mode = #tpu.pipeline_mode<synchronous>, transform_indices = @transform_2, window_bounds = array<i64: 1, 128>}, {transform_indices = @transform_3, window_bounds = array<i64: 32, 128>}]} {
    %c0 = arith.constant 0 : index
    %c0_0 = arith.constant 0 : index
    %0 = vector.load %arg1[%c0, %c0_0] : memref<32x64xf32, #tpu.memory_space<vmem>>, vector<32x64xf32>
    %c0_1 = arith.constant 0 : index
    %c0_2 = arith.constant 0 : index
    %1 = vector.load %arg2[%c0_1, %c0_2] : memref<64x128xf32, #tpu.memory_space<vmem>>, vector<64x128xf32>
    %cst = arith.constant dense<0.000000e+00> : vector<32x128xf32>
    %2 = tpu.matmul %0, %1, %cst {dimension_numbers = #tpu.dot_dimension_numbers<[1], [0], [0], [1], [0, 0, 1, 1], [], []>} : vector<32x64xf32>, vector<64x128xf32>, vector<32x128xf32> -> vector<32x128xf32>
    %c0_3 = arith.constant 0 : index
    %c0_4 = arith.constant 0 : index
    %3 = vector.load %arg3[%c0_3, %c0_4] : memref<1x128xf32, #tpu.memory_space<vmem>>, vector<1x128xf32>
    %4 = vector.broadcast %3 : vector<1x128xf32> to vector<32x128xf32>
    %5 = arith.addf %2, %4 : vector<32x128xf32>
    %c0_5 = arith.constant 0 : index
    %c0_6 = arith.constant 0 : index
    %6 = vector.load %arg4[%c0_5, %c0_6] : memref<32x128xf32, #tpu.memory_space<vmem>>, vector<32x128xf32>
    tpu.vector_store %arg4[%c0_5, %c0_6], %5 {strides = array<i32>} : memref<32x128xf32, #tpu.memory_space<vmem>>, vector<32x128xf32>,
    return
  }
  func.func @transform_0(%arg0: i32) -> (i32, i32) {
    %c0_i32 = arith.constant 0 : i32
    %c0_i32_0 = arith.constant 0 : i32
    return %arg0, %c0_i32 : i32, i32
  }
  func.func @transform_1(%arg0: i32) -> (i32, i32) {
    %c0_i32 = arith.constant 0 : i32
    %c0_i32_0 = arith.constant 0 : i32
    %c0_i32_1 = arith.constant 0 : i32
    return %c0_i32, %c0_i32_0 : i32, i32
  }
  func.func @transform_2(%arg0: i32) -> (i32, i32) {
    %c0_i32 = arith.constant 0 : i32
    %c0_i32_0 = arith.constant 0 : i32
    %c0_i32_1 = arith.constant 0 : i32
    return %c0_i32, %c0_i32_0 : i32, i32
  }
  func.func @transform_3(%arg0: i32) -> (i32, i32) {
    %c0_i32 = arith.constant 0 : i32
    %c0_i32_0 = arith.constant 0 : i32
    return %arg0, %c0_i32 : i32, i32
  }
}

</mosaic_0001>

<bundles_post_ra>
// kernel: _patch_embed_tokens.1
= control target key start
LH: loop header
LB: loop body
LE: loop exit
PB: predicated region body
PF: predicated region fallthrough
CT: control target
= control target key end

     0   :  { %s297_s0 = inlined_call_operand.vmem [shape: f32[32,64], index: 0, kind: input, shape index: {}]   ;;  %s298_s1 = inlined_call_operand.vmem [shape: f32[64,128], index: 1, kind: input, shape index: {}]   ;;  %s299_s2 = inlined_call_operand.vmem [shape: f32[1,128], index: 2, kind: input, shape index: {}]   ;;  %s300_s3 = inlined_call_operand.hbm [shape: f32[32,128], index: 3, kind: output, shape index: {}]  }
   0x1   :  { %v26_v0 = vld [vmem:[%s298_s1 + $0x38] sm:$0xff]  ;;  %v25_v1 = vld [vmem:[%s298_s1 + $0x30] sm:$0xff]  ;;  %v24_v2 = vld [vmem:[%s298_s1 + $0x28] sm:$0xff] }
   0x2   :  { %169 = vmatprep.subr.mxu0 %v26_v0  ;;  %191 = vmatprep.subr.mxu1 %v26_v0  ;;  %v23_v3 = vld [vmem:[%s298_s1 + $0x20] sm:$0xff] }
   0x3   :  { %170 = vmatpush3.msra.mxu0 %v26_v0  ;;  %199 = vmatpush3.msra.mxu1 %v26_v0 }
   0x4   :  { %171 = vmatprep.subr.mxu0 %v25_v1  ;;  %192 = vmatprep.subr.mxu1 %v25_v1 }
   0x5   :  { %172 = vmatpush3.msra.mxu0 %v25_v1  ;;  %200 = vmatpush3.msra.mxu1 %v25_v1 }
   0x6   :  { %8 = vsyncpa [#allocation3], 0  ;;  %173 = vmatprep.subr.mxu0 %v24_v2  ;;  %193 = vmatprep.subr.mxu1 %v24_v2  ;;  %v22_v4 = vld [vmem:[%s298_s1 + $0x18] sm:$0xff]  ;;  %v21_v5 = vld [vmem:[%s298_s1 + $0x10] sm:$0xff]  ;;  %vm34_vm0 = vcmask 523264   ;;  %s232_s10 = smov [#allocation2]  }
   0x7   :  { %174 = vmatpush3.msra.mxu0 %v24_v2  ;;  %201 = vmatpush3.msra.mxu1 %v24_v2  ;;  %v20_v6 = vld [vmem:[%s298_s1 + $0x8] sm:$0xff]  ;;  %v19_v7 = vld [vmem:[%s298_s1] sm:$0xff]  ;;  %v17_v9 = vld [vmem:[%s297_s0 + $0x10] sm:$0xff]  ;;  %s141_s11 = sshll.u32 %s232_s10, 4  ;;  %s142_s11 = int_to_ptr.vmem [resolvable:$true] %s141_s11 }
   0x8   :  { %175 = vmatprep.subr.mxu0 %v23_v3  ;;  %194 = vmatprep.subr.mxu1 %v23_v3  ;;  %v15_v8 = vld [vmem:[%s297_s0] sm:$0xff]  ;;  %v16_v10 = vld [vmem:[%s297_s0 + $0x8] sm:$0xff]  ;;  %v18_v11 = vld [vmem:[%s297_s0 + $0x18] sm:$0xff]  ;;  %s210_s0 = scalar_lea.vmem %s142_s11, 512  ;;  %p215_p1 = scmp.lt.s32.totalorder %s142_s11, %s142_s11 }
   0x9   :  { %176 = vmatpush3.msra.mxu0 %v23_v3  ;;  %202 = vmatpush3.msra.mxu1 %v23_v3  ;;  %v152_v12 = vld [vmem:[%s299_s2] ss:$0 sm:$0xff]  ;;  %p211_p0 = scmp.ne.s32.totalorder %s142_s11, %s210_s0  ;;  %p216_p2 = scmp.lt.s32.totalorder %s210_s0, %s210_s0 }
   0xa   :  { %177 = vmatprep.subr.mxu0 %v22_v4  ;;  %195 = vmatprep.subr.mxu1 %v22_v4 }
   0xb   :  { %178 = vmatpush3.msra.mxu0 %v22_v4  ;;  %203 = vmatpush3.msra.mxu1 %v22_v4  ;;  %p217_p3 = por %p216_p2, %p215_p1 }
   0xc   :  { %179 = vmatprep.subr.mxu0 %v21_v5  ;;  %196 = vmatprep.subr.mxu1 %v21_v5 }
   0xd   :  { %180 = vmatpush3.msra.mxu0 %v21_v5  ;;  %204 = vmatpush3.msra.mxu1 %v21_v5  ;;  %p218_p4 = pnand %p217_p3, %p211_p0 }
   0xe   :  { %181 = vmatprep.subr.mxu0 %v20_v6  ;;  %197 = vmatprep.subr.mxu1 %v20_v6 }
   0xf   :  { %182 = vmatpush3.msra.mxu0 %v20_v6  ;;  %205 = vmatpush3.msra.mxu1 %v20_v6 }
  0x10   :  { %183 = vmatprep.subr.mxu0 %v19_v7  ;;  %198 = vmatprep.subr.mxu1 %v19_v7 }
  0x11   :  { %184 = vmatpush3.msra.mxu0 %v19_v7  ;;  %206 = vmatpush3.msra.mxu1 %v19_v7 }
  0x12   :  { %185 = vmatprep.mubr.msk.f32.mxu0 %vm34_vm0, %v15_v8  ;;  %188 = vmatprep.mubr.msk.f32.mxu1 %vm34_vm0, %v17_v9 }
  0x13   :  { %186 = vmatmul.mubr.msk.f32.vlgmr.msra.gmra.mxu0 %vm34_vm0, %v16_v10  ;;  %189 = vmatmul.mubr.msk.f32.vlgmr.msra.gmra.mxu1 %vm34_vm0, %v18_v11 }
  0xd3   :  { %v187_v13 = vpop.f32.mrf.mxu0  ;;  %v190_v14 = vpop.f32.mrf.mxu1 }
  0xd4   :  { %v119_v15 = vadd.f32 %v187_v13, %v152_v12  ;;  %v129_v16 = vadd.f32 %v190_v14, %v152_v12 }
  0xd5   :  { %v113_v17 = vpop.f32.mrf.mxu0  ;;  %v123_v18 = vpop.f32.mrf.mxu1 }
  0xd6   :  { %133 = vst [vmem:[#allocation2 + $0x8] sm:$0xff] %v119_v15  ;;  %135 = vst [vmem:[#allocation2 + $0x18] sm:$0xff] %v129_v16  ;;  %v114_v19 = vadd.f32 %v152_v12, %v113_v17  ;;  %v124_v20 = vadd.f32 %v152_v12, %v123_v18 }
  0xd8   :  { %132 = vst [vmem:[#allocation2] sm:$0xff] %v114_v19  ;;  %134 = vst [vmem:[#allocation2 + $0x10] sm:$0xff] %v124_v20 }
  0xd9   :  { %221 = shalt.err (!%p218_p4)
}
  0xda   :  { %s233_s2 = smov 128   ;;  %s234_s12 = smov 8  }
  0xdb   :  { %147 = dma.vmem_to_hbm [thread:$0]  %s142_s11, 512, %s300_s3, [#allocation3], %s233_s2, %s233_s2, %s234_s12  }
  0xdc   :  { %230 = dma.done.wait [#allocation3], 512  }
  0xdd   :  { %231 = vsyncadd [#allocation3], 4294966784 }
  0xde   :  { %151 = vsyncpa [#allocation3], 1 }

</bundles_post_ra>
